<compile_context>
chip_gen: v7x
topology: tpu7x:2x2x1
jax: 0.10.0
libtpu: 0.0.40
codegen_flags: <defaults>
</compile_context>

<pallas_src>
import math

import jax
import jax.numpy as jnp
from jax import lax
from jax.experimental import pallas as pl
from jax.experimental.pallas import tpu as pltpu


# --------------------------------------------------------------------------- #
# Kernel
# --------------------------------------------------------------------------- #
def _attention_kernel(x_ref, w_ref, be_ref, ve_ref, out_ref):
    m = x_ref.shape[0]            # TB * c_in   (flattened "row" dim)
    c = be_ref.shape[-1]          # c_in
    tb = m // c                   # batch tile
    n = w_ref.shape[-1] // 2      # num_nodes

    xb = x_ref[...]                                                       # (M, 2N K-side)

    # One fused MXU matmul for both weighted reductions, f32 accumulation:
    #   columns [0:N)  -> y1 = (w1-weighted sum over nodes) @ W2^T
    #   columns [N:2N) -> y2 = w3-weighted sum over features
    y = jnp.dot(xb, w_ref[...], preferred_element_type=jnp.float32)       # (M, 2N)
    # NOTE: reshapes below are layout-free only when c_in aligns with the
    # sublane granule (c_in = 8 here); the tile picker keeps m % 8 == 0.
    y1 = y[:, :n].reshape(tb, c, n)
    y2 = y[:, n:].reshape(tb, c, n)

    # product[b, i, u] = sum_n y1[b, i, n] * y2[b, u, n]
    p3 = lax.dot_general(y1, y2, (((2,), (2,)), ((0,), (0,))),
                         preferred_element_type=jnp.float32)              # (TB, c, c)

    # sigmoid(product + be); be broadcast in-kernel (no TB-tiled HBM operand).
    sig3 = jax.nn.sigmoid(p3 + be_ref[...][None, :, :])                   # (TB, c, c)

    # E[b, t, u] = sum_i ve[t, i] * sig[b, i, u]   (no kron(I_TB, ve) operand)
    ve_b = jnp.broadcast_to(ve_ref[...], (tb, c, c))
    e3 = lax.dot_general(ve_b, sig3, (((2,), (1,)), ((0,), (0,))),
                         preferred_element_type=jnp.float32)              # (TB, c, c)

    # Row softmax; normalization via the EUP approximate reciprocal.
    e = e3.reshape(m, c)
    e = jnp.exp(e - jnp.max(e, axis=-1, keepdims=True))
    inv = pl.reciprocal(jnp.sum(e, axis=-1, keepdims=True), approx=True)
    out_ref[...] = (e * inv).astype(out_ref.dtype)


# --------------------------------------------------------------------------- #
# Hardware-aware tiling helpers
# --------------------------------------------------------------------------- #
def _tpu_hw_info():
    """(vmem_capacity_bytes, num_tensorcores) with safe fallbacks."""
    vmem_capacity = 64 << 20      # conservative default (v7x per-TC)
    num_tc = 1
    try:
        info = pltpu.get_tpu_info()
        cap = getattr(info, "vmem_capacity_bytes", None)
        if cap:
            vmem_capacity = int(cap)
        for name in ("num_tensorcores", "tensorcores_per_chip",
                     "num_cores", "cores_per_chip", "core_count"):
            v = getattr(info, name, None)
            if v:
                num_tc = int(v)
                break
    except Exception:
        pass
    try:
        kind = jax.devices()[0].device_kind.lower()
        if "v7" in kind:           # v7x has 2 TensorCores per chip
            num_tc = max(num_tc, 2)
    except Exception:
        pass
    return vmem_capacity, num_tc


def _vmem_bytes_estimate(tb, c_in, num_nodes, f_in, itemsize):
    """Rough VMEM footprint for one grid step (double-buffered I/O + temps)."""
    m = tb * c_in
    x_blk = m * num_nodes * f_in * itemsize
    w_blk = num_nodes * f_in * 2 * num_nodes * itemsize
    small = 2 * c_in * c_in * 4                      # be + ve (f32)
    out_blk = m * c_in * 4
    temps = m * 2 * num_nodes * 4 * 3 + tb * c_in * c_in * 4 * 4
    return 2 * (x_blk + w_blk + small + out_blk) + temps


def _pick_batch_tile(batch, c_in, num_nodes, f_in, itemsize, *,
                     num_tc, vmem_budget):
    """Generation-aware batch tile.

    Single-TC chips (v5e/v6e): grid=1 (tb=batch) whenever it fits the VMEM
    budget — the kernel is per-grid-step-overhead bound at these shapes.
    Multi-TC chips (v7x): prefer >= 2 grid steps per TensorCore so the
    BlockSpec double-buffer can hide the x DMA, falling back gracefully.
    """
    divisors = [d for d in range(1, batch + 1) if batch % d == 0]

    def aligned(d):   # block first dim must be a multiple of 8 or the full dim
        return d == batch or (d * c_in) % 8 == 0

    def fits(d):
        return _vmem_bytes_estimate(d, c_in, num_nodes, f_in, itemsize) <= vmem_budget

    cands = [d for d in divisors if aligned(d) and fits(d)]
    if not cands:
        cands = [d for d in divisors if aligned(d)] or divisors

    if num_tc <= 1:
        return max(cands)
    for steps_per_core in (2, 1):
        sub = [d for d in cands if batch // d >= steps_per_core * num_tc]
        if sub:
            return max(sub)
    return max(cands)


# --------------------------------------------------------------------------- #
# Wrapper
# --------------------------------------------------------------------------- #
def temporal_attention(x, w1, w2_weight, w3, be, ve, *,
                       compute_dtype=jnp.bfloat16, batch_tile=None):
    """x: (B, c_in, num_nodes, f_in) -> (B, c_in, c_in) float32."""
    B, c_in, N, F = x.shape
    itemsize = jnp.dtype(compute_dtype).itemsize

    vmem_capacity, num_tc = _tpu_hw_info()
    vmem_budget = vmem_capacity // 2
    tb = batch_tile if batch_tile is not None else _pick_batch_tile(
        B, c_in, N, F, itemsize, num_tc=num_tc, vmem_budget=vmem_budget)
    assert B % tb == 0, f"batch {B} must be divisible by batch tile {tb}"
    m = tb * c_in
    assert m == B * c_in or m % 8 == 0, \
        f"block row dim {m} must be a multiple of 8 (or the full {B * c_in})"

    # Lane-dense, matmul-ready x: (B*c_in, N*F). Free reshape in XLA.
    x_flat = x.reshape(B * c_in, N * F).astype(compute_dtype)

    # Fused (N*F, 2N) weight operand, folded in f32 then cast once:
    #   columns [0:N)  : w1 (outer) W2^T    (w1-reduce over N fused with Linear)
    #   columns [N:2N) : blockdiag(w3)      (w3-reduce over F)
    w2t = jnp.transpose(w2_weight).astype(jnp.float32)                     # (F, N)
    w12 = (w1.astype(jnp.float32)[:, None, None] * w2t[None, :, :]
           ).reshape(N * F, N)
    w3bd = (jnp.eye(N, dtype=jnp.float32)[:, None, :]
            * w3.astype(jnp.float32)[None, :, None]
            ).reshape(N * F, N)
    w_fused = jnp.concatenate([w12, w3bd], axis=1).astype(compute_dtype)   # (N*F, 2N)

    # Small per-call operands stay (c_in, c_in) f32; broadcast happens in-kernel.
    be2 = be.reshape(c_in, c_in).astype(jnp.float32)
    ve2 = ve.astype(jnp.float32)

    est = _vmem_bytes_estimate(tb, c_in, N, F, itemsize)
    vmem_limit = int(min(max(32 << 20, 4 * est), (vmem_capacity * 3) // 4))

    grid_spec = pltpu.PrefetchScalarGridSpec(
        num_scalar_prefetch=0,
        grid=(B // tb,),
        in_specs=[
            pl.BlockSpec((m, N * F), lambda b: (b, 0)),       # x, batch-tiled
            pl.BlockSpec((N * F, 2 * N), lambda b: (0, 0)),   # fused weights
            pl.BlockSpec((c_in, c_in), lambda b: (0, 0)),     # be (full block)
            pl.BlockSpec((c_in, c_in), lambda b: (0, 0)),     # ve (full block)
        ],
        out_specs=pl.BlockSpec((m, c_in), lambda b: (b, 0)),
    )

    out_flat = pl.pallas_call(
        _attention_kernel,
        out_shape=jax.ShapeDtypeStruct((B * c_in, c_in), jnp.float32),
        grid_spec=grid_spec,
        compiler_params=pltpu.CompilerParams(
            dimension_semantics=("parallel",),
            vmem_limit_bytes=vmem_limit),
    )(x_flat, w_fused, be2, ve2)

    return out_flat.reshape(B, c_in, c_in)


# --------------------------------------------------------------------------- #
# Pure-JAX reference + init
# --------------------------------------------------------------------------- #
def temporal_attention_reference(x, w1, w2_weight, w3, be, ve):
    """Pure-JAX f32 reference mirroring the PyTorch forward."""
    y1 = jnp.einsum('btnf,n->btf', x, w1) @ w2_weight.T      # (B, c_in, N)
    y2 = jnp.einsum('btnf,f->btn', x, w3)                    # (B, c_in, N)
    product = jnp.einsum('btn,bsn->bts', y1, y2)             # (B, c_in, c_in)
    E = jnp.einsum('ts,bsu->btu', ve, jax.nn.sigmoid(product + be))
    return jax.nn.softmax(E, axis=-1)


def init_params(key, num_nodes, f_in, c_in):
    """Deterministic parameter init matching the module's __init__."""
    k1, k2, k3, k4, k5 = jax.random.split(key, 5)
    w1 = jax.random.uniform(k1, (num_nodes,), jnp.float32)
    b2 = 1.0 / math.sqrt(f_in)
    w2_weight = jax.random.uniform(k2, (num_nodes, f_in), jnp.float32, -b2, b2)
    w3 = jax.random.uniform(k3, (f_in,), jnp.float32)
    bk = 1.0 / math.sqrt(c_in)
    be = jax.random.uniform(k4, (1, c_in, c_in), jnp.float32, -bk, bk)
    ve = jax.random.uniform(k5, (c_in, c_in), jnp.float32, -bk, bk)
    return w1, w2_weight, w3, be, ve


if __name__ == "__main__":
    B, c_in, num_nodes, f_in = 16, 8, 16, 32

    key = jax.random.PRNGKey(0)
    kx, kp = jax.random.split(key)
    x = jax.random.normal(kx, (B, c_in, num_nodes, f_in), jnp.float32)
    w1, w2_weight, w3, be, ve = init_params(kp, num_nodes, f_in, c_in)

    ref = temporal_attention_reference(x, w1, w2_weight, w3, be, ve)

    # Primary path: bf16-fed MXU operands, f32 accumulation, hardware-picked tile.
    out_bf16 = jax.block_until_ready(
        temporal_attention(x, w1, w2_weight, w3, be, ve,
                           compute_dtype=jnp.bfloat16))
    assert out_bf16.shape == (B, c_in, c_in), out_bf16.shape
    err_bf16 = jnp.max(jnp.abs(out_bf16 - ref))
    assert jnp.allclose(out_bf16, ref, atol=3e-2, rtol=3e-2), \
        f"bf16 path max abs err {err_bf16}"

    # f32-fed path (tighter check; approx reciprocal bounds accuracy ~1e-3).
    out_f32 = jax.block_until_ready(
        temporal_attention(x, w1, w2_weight, w3, be, ve,
                           compute_dtype=jnp.float32))
    err_f32 = jnp.max(jnp.abs(out_f32 - ref))
    assert jnp.allclose(out_f32, ref, atol=5e-3, rtol=5e-3), \
        f"f32 path max abs err {err_f32}"

    # Forced multi-step grid (exercises the batch-tiled / multi-TC code path
    # regardless of which chip generation this runs on).
    out_tiled = jax.block_until_ready(
        temporal_attention(x, w1, w2_weight, w3, be, ve,
                           compute_dtype=jnp.bfloat16, batch_tile=4))
    err_tiled = jnp.max(jnp.abs(out_tiled - ref))
    assert jnp.allclose(out_tiled, ref, atol=3e-2, rtol=3e-2), \
        f"tiled path max abs err {err_tiled}"

    print("KERNEL_OK")
</pallas_src>

<mosaic_0001>
module attributes {stable_mosaic.version = 11 : i64} {
  func.func @_attention_kernel(%arg0: i32, %arg1: memref<128x512xbf16, #tpu.memory_space<vmem>>, %arg2: memref<512x32xbf16, #tpu.memory_space<vmem>>, %arg3: memref<8x8xf32, #tpu.memory_space<vmem>>, %arg4: memref<8x8xf32, #tpu.memory_space<vmem>>, %arg5: memref<128x8xf32, #tpu.memory_space<vmem>>) attributes {dimension_semantics = [#tpu.dimension_semantics<parallel>], iteration_bounds = array<i64: 1>, scalar_prefetch = 0 : i64, scratch_operands = 0 : i64, tpu.core_type = #tpu.core_type<tc>, window_params = [{transform_indices = @transform_0, window_bounds = array<i64: 128, 512>}, {pipeline_mode = #tpu.pipeline_mode<synchronous>, transform_indices = @transform_1, window_bounds = array<i64: 512, 32>}, {pipeline_mode = #tpu.pipeline_mode<synchronous>, transform_indices = @transform_2, window_bounds = array<i64: 8, 8>}, {pipeline_mode = #tpu.pipeline_mode<synchronous>, transform_indices = @transform_3, window_bounds = array<i64: 8, 8>}, {transform_indices = @transform_4, window_bounds = array<i64: 128, 8>}]} {
    %c0 = arith.constant 0 : index
    %c0_0 = arith.constant 0 : index
    %0 = vector.load %arg1[%c0, %c0_0] : memref<128x512xbf16, #tpu.memory_space<vmem>>, vector<128x512xbf16>
    %c0_1 = arith.constant 0 : index
    %c0_2 = arith.constant 0 : index
    %1 = vector.load %arg2[%c0_1, %c0_2] : memref<512x32xbf16, #tpu.memory_space<vmem>>, vector<512x32xbf16>
    %cst = arith.constant dense<0.000000e+00> : vector<128x32xf32>
    %2 = tpu.matmul %0, %1, %cst {dimension_numbers = #tpu.dot_dimension_numbers<[1], [0], [0], [1], [0, 0, 1, 1], [], []>} : vector<128x512xbf16>, vector<512x32xbf16>, vector<128x32xf32> -> vector<128x32xf32>
    %3 = vector.extract_strided_slice %2 {offsets = [0, 0], sizes = [128, 16], strides = [1, 1]} : vector<128x32xf32> to vector<128x16xf32>
    %4 = vector.shape_cast %3 : vector<128x16xf32> to vector<16x8x16xf32>
    %5 = vector.extract_strided_slice %2 {offsets = [0, 16], sizes = [128, 16], strides = [1, 1]} : vector<128x32xf32> to vector<128x16xf32>
    %6 = vector.shape_cast %5 : vector<128x16xf32> to vector<16x8x16xf32>
    %cst_3 = arith.constant dense<0.000000e+00> : vector<16x8x8xf32>
    %7 = tpu.matmul %4, %6, %cst_3 {dimension_numbers = #tpu.dot_dimension_numbers<[2], [2], [1], [1], [0, 0, 0, 1, 1, 1], [0], [0]>} : vector<16x8x16xf32>, vector<16x8x16xf32>, vector<16x8x8xf32> -> vector<16x8x8xf32>
    %c0_4 = arith.constant 0 : index
    %c0_5 = arith.constant 0 : index
    %8 = vector.load %arg3[%c0_4, %c0_5] : memref<8x8xf32, #tpu.memory_space<vmem>>, vector<8x8xf32>
    %9 = vector.shape_cast %8 : vector<8x8xf32> to vector<1x8x8xf32>
    %10 = vector.broadcast %9 : vector<1x8x8xf32> to vector<16x8x8xf32>
    %11 = arith.addf %7, %10 : vector<16x8x8xf32>
    %12 = arith.negf %11 : vector<16x8x8xf32>
    %13 = math.exp %12 : vector<16x8x8xf32>
    %cst_6 = arith.constant 1.000000e+00 : f32
    %14 = vector.broadcast %cst_6 : f32 to vector<16x8x8xf32>
    %15 = arith.addf %14, %13 : vector<16x8x8xf32>
    %16 = arith.divf %14, %15 : vector<16x8x8xf32>
    %c0_7 = arith.constant 0 : index
    %c0_8 = arith.constant 0 : index
    %17 = vector.load %arg4[%c0_7, %c0_8] : memref<8x8xf32, #tpu.memory_space<vmem>>, vector<8x8xf32>
    %18 = vector.shape_cast %17 : vector<8x8xf32> to vector<1x8x8xf32>
    %19 = vector.broadcast %18 : vector<1x8x8xf32> to vector<16x8x8xf32>
    %cst_9 = arith.constant dense<0.000000e+00> : vector<16x8x8xf32>
    %20 = tpu.matmul %19, %16, %cst_9 {dimension_numbers = #tpu.dot_dimension_numbers<[2], [1], [1], [2], [0, 0, 0, 1, 1, 2], [0], [0]>} : vector<16x8x8xf32>, vector<16x8x8xf32>, vector<16x8x8xf32> -> vector<16x8x8xf32>
    %21 = vector.shape_cast %20 : vector<16x8x8xf32> to vector<128x8xf32>
    %cst_10 = arith.constant dense<0xFF800000> : vector<128xf32>
    %22 = vector.multi_reduction <maximumf>, %21, %cst_10 [1] : vector<128x8xf32> to vector<128xf32>
    %23 = vector.shape_cast %22 : vector<128xf32> to vector<128x1xf32>
    %24 = vector.broadcast %23 : vector<128x1xf32> to vector<128x8xf32>
    %25 = arith.subf %21, %24 : vector<128x8xf32>
    %26 = math.exp %25 : vector<128x8xf32>
    %cst_11 = arith.constant dense<0.000000e+00> : vector<128xf32>
    %27 = vector.multi_reduction <add>, %26, %cst_11 [1] : vector<128x8xf32> to vector<128xf32>
    %28 = vector.shape_cast %27 : vector<128xf32> to vector<128x1xf32>
    %29 = tpu.reciprocal %28 {approx = true} : vector<128x1xf32> -> vector<128x1xf32>
    %30 = vector.broadcast %29 : vector<128x1xf32> to vector<128x8xf32>
    %31 = arith.mulf %26, %30 : vector<128x8xf32>
    %c0_12 = arith.constant 0 : index
    %c0_13 = arith.constant 0 : index
    %32 = vector.load %arg5[%c0_12, %c0_13] : memref<128x8xf32, #tpu.memory_space<vmem>>, vector<128x8xf32>
    tpu.vector_store %arg5[%c0_12, %c0_13], %31 {strides = array<i32>} : memref<128x8xf32, #tpu.memory_space<vmem>>, vector<128x8xf32>,
    return
  }
  func.func @transform_0(%arg0: i32) -> (i32, i32) {
    %c0_i32 = arith.constant 0 : i32
    %c0_i32_0 = arith.constant 0 : i32
    return %arg0, %c0_i32 : i32, i32
  }
  func.func @transform_1(%arg0: i32) -> (i32, i32) {
    %c0_i32 = arith.constant 0 : i32
    %c0_i32_0 = arith.constant 0 : i32
    %c0_i32_1 = arith.constant 0 : i32
    return %c0_i32, %c0_i32_0 : i32, i32
  }
  func.func @transform_2(%arg0: i32) -> (i32, i32) {
    %c0_i32 = arith.constant 0 : i32
    %c0_i32_0 = arith.constant 0 : i32
    %c0_i32_1 = arith.constant 0 : i32
    return %c0_i32, %c0_i32_0 : i32, i32
  }
  func.func @transform_3(%arg0: i32) -> (i32, i32) {
    %c0_i32 = arith.constant 0 : i32
    %c0_i32_0 = arith.constant 0 : i32
    %c0_i32_1 = arith.constant 0 : i32
    return %c0_i32, %c0_i32_0 : i32, i32
  }
  func.func @transform_4(%arg0: i32) -> (i32, i32) {
    %c0_i32 = arith.constant 0 : i32
    %c0_i32_0 = arith.constant 0 : i32
    return %arg0, %c0_i32 : i32, i32
  }
}

</mosaic_0001>

<bundles_post_ra>
// kernel: tpu_custom_call.1
= control target key start
LH: loop header
LB: loop body
LE: loop exit
PB: predicated region body
PF: predicated region fallthrough
CT: control target
= control target key end

     0   :  { %vm4003_vm0 = vmmov 0   ;;  %vm664_vm1 = vcmask 130048   ;;  %vm1991_vm2 = vcmask 64512   ;;  %s4712_s1 = inlined_call_operand.vmem [shape: bf16[512,32], index: 1, kind: input, shape index: {}]   ;;  %s4713_s0 = inlined_call_operand.vmem [shape: bf16[128,512], index: 0, kind: input, shape index: {}]   ;;  %s4714_s2 = inlined_call_operand.vmem [shape: f32[8,8], index: 2, kind: input, shape index: {}]   ;;  %s4715_s3 = inlined_call_operand.vmem [shape: f32[8,8], index: 3, kind: input, shape index: {}]   ;;  %s4716_s4 = inlined_call_operand.vmem [shape: f32[128,8], index: 4, kind: output, shape index: {}]  }
   0x1   :  { %v3794_v0 = vld [vmem:[%s4712_s1 + $0x40] sm:$0xff]   ;;  %v3798_v4 = vld [vmem:[%s4712_s1 + $0x48] sm:$0xff]   ;;  %v3802_v8 = vld [vmem:[%s4712_s1 + $0x50] sm:$0xff]  }
   0x2   :  { %v3795_v1 = vld [vmem:[%s4712_s1 + $0xc0] sm:$0xff]   ;;  %3439 = vmatprep.subr.bf16.mxu0 %v3794_v0  ;;  %v3799_v5 = vld [vmem:[%s4712_s1 + $0xc8] sm:$0xff]   ;;  %v3803_v9 = vld [vmem:[%s4712_s1 + $0xd0] sm:$0xff]   ;;  %v4002_v0 = vmov 0.0  }
   0x3   :  { %v3796_v2 = vld [vmem:[%s4712_s1] sm:$0xff]   ;;  %3503 = vmatprep.subr.bf16.mxu1 %v3795_v1  ;;  %v3800_v6 = vld [vmem:[%s4712_s1 + $0x8] sm:$0xff]   ;;  %v3804_v10 = vld [vmem:[%s4712_s1 + $0x10] sm:$0xff]  }
   0x4   :  { %v3797_v3 = vld [vmem:[%s4712_s1 + $0x80] sm:$0xff]   ;;  %3440 = vmatpush3.bf16.msra.mxu0 %v3796_v2  ;;  %v3801_v7 = vld [vmem:[%s4712_s1 + $0x88] sm:$0xff]   ;;  %v3805_v11 = vld [vmem:[%s4712_s1 + $0x90] sm:$0xff]  }
   0x5   :  { %3504 = vmatpush3.bf16.msra.mxu1 %v3797_v3  ;;  %3441 = vmatprep.subr.bf16.mxu0 %v3798_v4  ;;  %v3806_v12 = vld [vmem:[%s4712_s1 + $0x58] sm:$0xff]   ;;  %v3810_v16 = vld [vmem:[%s4712_s1 + $0x60] sm:$0xff]   ;;  %v3814_v20 = vld [vmem:[%s4712_s1 + $0x68] sm:$0xff]  }
   0x6   :  { %3505 = vmatprep.subr.bf16.mxu1 %v3799_v5  ;;  %v3807_v13 = vld [vmem:[%s4712_s1 + $0xd8] sm:$0xff]   ;;  %v3811_v17 = vld [vmem:[%s4712_s1 + $0xe0] sm:$0xff]   ;;  %v3815_v21 = vld [vmem:[%s4712_s1 + $0xe8] sm:$0xff]  }
   0x7   :  { %v3808_v14 = vld [vmem:[%s4712_s1 + $0x18] sm:$0xff]   ;;  %v3812_v18 = vld [vmem:[%s4712_s1 + $0x20] sm:$0xff]   ;;  %v3816_v22 = vld [vmem:[%s4712_s1 + $0x28] sm:$0xff]  }
   0x8   :  { %3442 = vmatpush3.bf16.msra.mxu0 %v3800_v6  ;;  %v3809_v15 = vld [vmem:[%s4712_s1 + $0x98] sm:$0xff]   ;;  %v3813_v19 = vld [vmem:[%s4712_s1 + $0xa0] sm:$0xff]   ;;  %v3817_v23 = vld [vmem:[%s4712_s1 + $0xa8] sm:$0xff]  }
   0x9   :  { %3506 = vmatpush3.bf16.msra.mxu1 %v3801_v7  ;;  %3443 = vmatprep.subr.bf16.mxu0 %v3802_v8  ;;  %v3818_v24 = vld [vmem:[%s4712_s1 + $0x70] sm:$0xff]   ;;  %v3822_v28 = vld [vmem:[%s4712_s1 + $0x78] sm:$0xff]  }
   0xa   :  { %3507 = vmatprep.subr.bf16.mxu1 %v3803_v9  ;;  %v3819_v25 = vld [vmem:[%s4712_s1 + $0xf0] sm:$0xff]   ;;  %v3823_v29 = vld [vmem:[%s4712_s1 + $0xf8] sm:$0xff]  }
   0xb   :  { %v3820_v26 = vld [vmem:[%s4712_s1 + $0x30] sm:$0xff]   ;;  %v3824_v30 = vld [vmem:[%s4712_s1 + $0x38] sm:$0xff]  }
   0xc   :  { %3444 = vmatpush3.bf16.msra.mxu0 %v3804_v10  ;;  %v3821_v27 = vld [vmem:[%s4712_s1 + $0xb0] sm:$0xff]   ;;  %v3825_v31 = vld [vmem:[%s4712_s1 + $0xb8] sm:$0xff]  }
   0xd   :  { %3508 = vmatpush3.bf16.msra.mxu1 %v3805_v11  ;;  %3445 = vmatprep.subr.bf16.mxu0 %v3806_v12  ;;  %v3826_v32 = vld [vmem:[%s4713_s0] ss:$16 sps:$4 sm:$0xff]   ;;  %v3828_v33 = vld [vmem:[%s4713_s0 + $0x4] ss:$16 sps:$4 sm:$0xff]   ;;  %v3829_v34 = vld [vmem:[%s4713_s0 + $0x8] ss:$16 sps:$4 sm:$0xff]  }
   0xe   :  { %3509 = vmatprep.subr.bf16.mxu1 %v3807_v13  ;;  %v3831_v35 = vld [vmem:[%s4713_s0 + $0xc] ss:$16 sps:$4 sm:$0xff]   ;;  %498 = vmatprep.mubr.bf16.mxu0 %v3828_v33  ;;  %v3832_v36 = vld [vmem:[%s4713_s0 + $0x24] ss:$16 sps:$4 sm:$0xff]   ;;  %v3836_v38 = vld [vmem:[%s4713_s0 + $0x20] ss:$16 sps:$4 sm:$0xff]  }
   0xf   :  { %595 = vmatprep.mubr.bf16.mxu1 %v3831_v35  ;;  %v3834_v37 = vld [vmem:[%s4713_s0 + $0x2c] ss:$16 sps:$4 sm:$0xff]   ;;  %v3837_v39 = vld [vmem:[%s4713_s0 + $0x28] ss:$16 sps:$4 sm:$0xff]   ;;  %v3838_v40 = vld [vmem:[%s4713_s0 + $0x44] ss:$16 sps:$4 sm:$0xff]  }
  0x10   :  { %3446 = vmatpush3.bf16.msra.mxu0 %v3808_v14  ;;  %v3840_v41 = vld [vmem:[%s4713_s0 + $0x4c] ss:$16 sps:$4 sm:$0xff]   ;;  %v3842_v42 = vld [vmem:[%s4713_s0 + $0x40] ss:$16 sps:$4 sm:$0xff]   ;;  %v3843_v43 = vld [vmem:[%s4713_s0 + $0x48] ss:$16 sps:$4 sm:$0xff]  }
  0x11   :  { %3510 = vmatpush3.bf16.msra.mxu1 %v3809_v15  ;;  %3447 = vmatprep.subr.bf16.mxu0 %v3810_v16  ;;  %v3844_v44 = vld [vmem:[%s4713_s0 + $0x64] ss:$16 sps:$4 sm:$0xff]   ;;  %v3846_v45 = vld [vmem:[%s4713_s0 + $0x6c] ss:$16 sps:$4 sm:$0xff]   ;;  %v3848_v46 = vld [vmem:[%s4713_s0 + $0x60] ss:$16 sps:$4 sm:$0xff]  }
  0x12   :  { %3511 = vmatprep.subr.bf16.mxu1 %v3811_v17  ;;  %v3849_v47 = vld [vmem:[%s4713_s0 + $0x68] ss:$16 sps:$4 sm:$0xff]   ;;  %v3850_v48 = vld [vmem:[%s4713_s0 + $0x84] ss:$16 sps:$4 sm:$0xff]   ;;  %v3852_v49 = vld [vmem:[%s4713_s0 + $0x8c] ss:$16 sps:$4 sm:$0xff]  }
  0x13   :  { %v3854_v50 = vld [vmem:[%s4713_s0 + $0x80] ss:$16 sps:$4 sm:$0xff]   ;;  %v3855_v51 = vld [vmem:[%s4713_s0 + $0x88] ss:$16 sps:$4 sm:$0xff]   ;;  %v3856_v52 = vld [vmem:[%s4713_s0 + $0xa4] ss:$16 sps:$4 sm:$0xff]  }
  0x14   :  { %3448 = vmatpush3.bf16.msra.mxu0 %v3812_v18  ;;  %v3858_v53 = vld [vmem:[%s4713_s0 + $0xac] ss:$16 sps:$4 sm:$0xff]   ;;  %v3860_v54 = vld [vmem:[%s4713_s0 + $0xa0] ss:$16 sps:$4 sm:$0xff]   ;;  %v3861_v55 = vld [vmem:[%s4713_s0 + $0xa8] ss:$16 sps:$4 sm:$0xff]  }
  0x15   :  { %3512 = vmatpush3.bf16.msra.mxu1 %v3813_v19  ;;  %3449 = vmatprep.subr.bf16.mxu0 %v3814_v20  ;;  %v3862_v56 = vld [vmem:[%s4713_s0 + $0xc4] ss:$16 sps:$4 sm:$0xff]   ;;  %v3864_v57 = vld [vmem:[%s4713_s0 + $0xcc] ss:$16 sps:$4 sm:$0xff]   ;;  %v3866_v58 = vld [vmem:[%s4713_s0 + $0xc0] ss:$16 sps:$4 sm:$0xff]  }
  0x16   :  { %3513 = vmatprep.subr.bf16.mxu1 %v3815_v21  ;;  %v3867_v59 = vld [vmem:[%s4713_s0 + $0xc8] ss:$16 sps:$4 sm:$0xff]   ;;  %v3868_v60 = vld [vmem:[%s4713_s0 + $0xe4] ss:$16 sps:$4 sm:$0xff]   ;;  %v3870_v61 = vld [vmem:[%s4713_s0 + $0xec] ss:$16 sps:$4 sm:$0xff]  }
  0x17   :  { %v3872_v62 = vld [vmem:[%s4713_s0 + $0xe0] ss:$16 sps:$4 sm:$0xff]   ;;  %v3873_v63 = vld [vmem:[%s4713_s0 + $0xe8] ss:$16 sps:$4 sm:$0xff]   ;;  %s4004_s0 = smov 112  }
  0x18   :  { %3450 = vmatpush3.bf16.msra.mxu0 %v3816_v22 }
  0x19   :  { %3514 = vmatpush3.bf16.msra.mxu1 %v3817_v23  ;;  %3451 = vmatprep.subr.bf16.mxu0 %v3818_v24 }
  0x1a   :  { %3515 = vmatprep.subr.bf16.mxu1 %v3819_v25 }
  0x1c   :  { %3452 = vmatpush3.bf16.msra.mxu0 %v3820_v26 }
  0x1d   :  { %3516 = vmatpush3.bf16.msra.mxu1 %v3821_v27  ;;  %3453 = vmatprep.subr.bf16.mxu0 %v3822_v28 }
  0x1e   :  { %3517 = vmatprep.subr.bf16.mxu1 %v3823_v29 }
  0x20   :  { %3454 = vmatpush3.bf16.msra.mxu0 %v3824_v30 }
  0x21   :  { %3518 = vmatpush3.bf16.msra.mxu1 %v3825_v31  ;;  %3631 = vmatprep.subr.mxu0 %v4002_v0 }
  0x22   :  { %3636 = vmatprep.subr.mxu1 %v4002_v0 }
  0x23   :  { %499 = vmatmul.mubr.bf16.vlgmr.msra.gmra.mrb[0].mxu0 %v3826_v32 }
  0x24   :  { %596 = vmatmul.mubr.bf16.vlgmr.msra.gmra.mrb[0].mxu1 %v3829_v34  ;;  %506 = vmatprep.mubr.bf16.mxu0 %v3832_v36 }
  0x25   :  { %603 = vmatprep.mubr.bf16.mxu1 %v3834_v37 }
  0x2b   :  { %507 = vmatmul.mubr.bf16.gmra.mrb[4].mxu0 %v3836_v38 }
  0x2c   :  { %604 = vmatmul.mubr.bf16.gmra.mrb[4].mxu1 %v3837_v39  ;;  %514 = vmatprep.mubr.bf16.mxu0 %v3838_v40 }
  0x2d   :  { %611 = vmatprep.mubr.bf16.mxu1 %v3840_v41 }
  0x33   :  { %515 = vmatmul.mubr.bf16.gmra.mrb[8].mxu0 %v3842_v42 }
  0x34   :  { %612 = vmatmul.mubr.bf16.gmra.mrb[8].mxu1 %v3843_v43  ;;  %522 = vmatprep.mubr.bf16.mxu0 %v3844_v44 }
  0x35   :  { %619 = vmatprep.mubr.bf16.mxu1 %v3846_v45 }
  0x3b   :  { %523 = vmatmul.mubr.bf16.gmra.mrb[12].mxu0 %v3848_v46 }
  0x3c   :  { %620 = vmatmul.mubr.bf16.gmra.mrb[12].mxu1 %v3849_v47  ;;  %530 = vmatprep.mubr.bf16.mxu0 %v3850_v48 }
  0x3d   :  { %627 = vmatprep.mubr.bf16.mxu1 %v3852_v49 }
  0x43   :  { %531 = vmatmul.mubr.bf16.gmra.mrb[16].mxu0 %v3854_v50 }
  0x44   :  { %628 = vmatmul.mubr.bf16.gmra.mrb[16].mxu1 %v3855_v51  ;;  %538 = vmatprep.mubr.bf16.mxu0 %v3856_v52 }
  0x45   :  { %635 = vmatprep.mubr.bf16.mxu1 %v3858_v53 }
  0x4b   :  { %539 = vmatmul.mubr.bf16.gmra.mrb[20].mxu0 %v3860_v54 }
  0x4c   :  { %636 = vmatmul.mubr.bf16.gmra.mrb[20].mxu1 %v3861_v55  ;;  %546 = vmatprep.mubr.bf16.mxu0 %v3862_v56 }
  0x4d   :  { %643 = vmatprep.mubr.bf16.mxu1 %v3864_v57 }
  0x53   :  { %547 = vmatmul.mubr.bf16.gmra.mrb[24].mxu0 %v3866_v58 }
  0x54   :  { %644 = vmatmul.mubr.bf16.gmra.mrb[24].mxu1 %v3867_v59  ;;  %554 = vmatprep.mubr.bf16.mxu0 %v3868_v60 }
  0x55   :  { %651 = vmatprep.mubr.bf16.mxu1 %v3870_v61 }
  0x5b   :  { %555 = vmatmul.mubr.bf16.gmra.mrb[28].mxu0 %v3872_v62 }
  0x5c   :  { %652 = vmatmul.mubr.bf16.gmra.mrb[28].mxu1 %v3873_v63  ;;  %3633 = vmatprep.mubr.msk.f32.mxu0 %vm4003_vm0, %v4002_v0 }
  0x5d   :  { %3638 = vmatprep.mubr.msk.f32.mxu1 %vm4003_vm0, %v4002_v0 }
  0xf6   :  { %v3455_v1 = vpop.f32.mrb[0].mxu0 }
  0xf7   :  { %v3519_v2 = vpop.f32.mrb[0].mxu1  ;;  %v3456_v3 = vpop.f32.mrb[1].mxu0 }
  0xf8   :  { %v3457_v4 = vadd.f32 %v3456_v3, %v3455_v1  ;;  %v3520_v5 = vpop.f32.mrb[1].mxu1  ;;  %v3458_v6 = vpop.f32.mrb[2].mxu0 }
  0xf9   :  { %v3521_v7 = vadd.f32 %v3520_v5, %v3519_v2  ;;  %v3522_v8 = vpop.f32.mrb[2].mxu1  ;;  %v3459_v9 = vpop.f32.mrb[3].mxu0 }
  0xfa   :  { %v3460_v10 = vadd.f32 %v3459_v9, %v3458_v6  ;;  %v3523_v11 = vpop.f32.mrb[3].mxu1 }
  0xfb   :  { %v3524_v12 = vadd.f32 %v3523_v11, %v3522_v8  ;;  %v4228_v13 = vadd.f32 %v3521_v7, %v3457_v4 }
  0xfd   :  { %v4230_v14 = vadd.f32 %v3524_v12, %v3460_v10  ;;  %662 = vrot.lane.b32.xlu0 %v4228_v13, %s4004_s0 }
  0xfe   :  { %v3461_v15 = vpop.f32.mrb[4].mxu0 }
  0xff   :  { %v3525_v16 = vpop.f32.mrb[4].mxu1  ;;  %v3462_v17 = vpop.f32.mrb[5].mxu0 }
 0x100   :  { %v3463_v18 = vadd.f32 %v3462_v17, %v3461_v15  ;;  %v3526_v19 = vpop.f32.mrb[5].mxu1  ;;  %v3464_v20 = vpop.f32.mrb[6].mxu0 }
 0x101   :  { %v3527_v21 = vadd.f32 %v3526_v19, %v3525_v16  ;;  %740 = vrot.lane.b32.xlu0 %v4230_v14, %s4004_s0  ;;  %v3528_v22 = vpop.f32.mrb[6].mxu1  ;;  %v3465_v23 = vpop.f32.mrb[7].mxu0 }
 0x102   :  { %v3466_v24 = vadd.f32 %v3465_v23, %v3464_v20  ;;  %v3529_v25 = vpop.f32.mrb[7].mxu1 }
 0x103   :  { %v3530_v26 = vadd.f32 %v3529_v25, %v3528_v22  ;;  %v4236_v27 = vadd.f32 %v3527_v21, %v3463_v18 }
 0x105   :  { %v4238_v28 = vadd.f32 %v3530_v26, %v3466_v24  ;;  %817 = vrot.lane.b32.xlu1 %v4236_v27, %s4004_s0 }
 0x106   :  { %v3467_v29 = vpop.f32.mrb[8].mxu0 }
 0x107   :  { %v3531_v30 = vpop.f32.mrb[8].mxu1  ;;  %v3468_v31 = vpop.f32.mrb[9].mxu0 }
 0x108   :  { %v3469_v32 = vadd.f32 %v3468_v31, %v3467_v29  ;;  %v3532_v33 = vpop.f32.mrb[9].mxu1  ;;  %v3470_v34 = vpop.f32.mrb[10].mxu0 }
 0x109   :  { %v3533_v35 = vadd.f32 %v3532_v33, %v3531_v30  ;;  %v3534_v36 = vpop.f32.mrb[10].mxu1  ;;  %894 = vrot.lane.b32.xlu1 %v4238_v28, %s4004_s0  ;;  %v3471_v37 = vpop.f32.mrb[11].mxu0 }
 0x10a   :  { %v3472_v38 = vadd.f32 %v3471_v37, %v3470_v34  ;;  %v3535_v39 = vpop.f32.mrb[11].mxu1 }
 0x10b   :  { %v4244_v40 = vadd.f32 %v3533_v35, %v3469_v32  ;;  %v3536_v41 = vadd.f32 %v3535_v39, %v3534_v36 }
 0x10d   :  { %v4246_v42 = vadd.f32 %v3536_v41, %v3472_v38  ;;  %971 = vrot.lane.b32.xlu0 %v4244_v40, %s4004_s0 }
 0x10e   :  { %v3473_v43 = vpop.f32.mrb[12].mxu0 }
 0x10f   :  { %v3537_v44 = vpop.f32.mrb[12].mxu1  ;;  %1048 = vrot.lane.b32.xlu1 %v4246_v42, %s4004_s0  ;;  %v3474_v45 = vpop.f32.mrb[13].mxu0 }
 0x110   :  { %v3475_v46 = vadd.f32 %v3474_v45, %v3473_v43  ;;  %v3538_v47 = vpop.f32.mrb[13].mxu1  ;;  %v3476_v48 = vpop.f32.mrb[14].mxu0 }
 0x111   :  { %v3539_v49 = vadd.f32 %v3538_v47, %v3537_v44  ;;  %v3540_v50 = vpop.f32.mrb[14].mxu1  ;;  %v3477_v51 = vpop.f32.mrb[15].mxu0 }
 0x112   :  { %v3478_v52 = vadd.f32 %v3477_v51, %v3476_v48  ;;  %v3541_v53 = vpop.f32.mrb[15].mxu1 }
 0x113   :  { %v4252_v54 = vadd.f32 %v3539_v49, %v3475_v46  ;;  %v3542_v55 = vadd.f32 %v3541_v53, %v3540_v50 }
 0x115   :  { %v4254_v56 = vadd.f32 %v3542_v55, %v3478_v52  ;;  %1125 = vrot.lane.b32.xlu0 %v4252_v54, %s4004_s0 }
 0x116   :  { %v3479_v57 = vpop.f32.mrb[16].mxu0 }
 0x117   :  { %v3543_v58 = vpop.f32.mrb[16].mxu1  ;;  %1202 = vrot.lane.b32.xlu1 %v4254_v56, %s4004_s0  ;;  %v3480_v59 = vpop.f32.mrb[17].mxu0 }
 0x118   :  { %v3481_v60 = vadd.f32 %v3480_v59, %v3479_v57  ;;  %v3544_v61 = vpop.f32.mrb[17].mxu1  ;;  %v3482_v62 = vpop.f32.mrb[18].mxu0 }
 0x119   :  { %v3545_v63 = vadd.f32 %v3544_v61, %v3543_v58  ;;  %v3546_v1 = vpop.f32.mrb[18].mxu1  ;;  %v3483_v2 = vpop.f32.mrb[19].mxu0 }
 0x11a   :  { %v3484_v3 = vadd.f32 %v3483_v2, %v3482_v62  ;;  %v3547_v4 = vpop.f32.mrb[19].mxu1 }
 0x11b   :  { %v4260_v5 = vadd.f32 %v3545_v63, %v3481_v60  ;;  %v3548_v6 = vadd.f32 %v3547_v4, %v3546_v1 }
 0x11d   :  { %v4262_v7 = vadd.f32 %v3548_v6, %v3484_v3  ;;  %1279 = vrot.lane.b32.xlu0 %v4260_v5, %s4004_s0  ;;  %v4391_v3 = vld [vmem:[%s4714_s2] sm:$0xff] }
 0x11e   :  { %v3485_v8 = vpop.f32.mrb[20].mxu0 }
 0x11f   :  { %v3549_v9 = vpop.f32.mrb[20].mxu1  ;;  %1356 = vrot.lane.b32.xlu1 %v4262_v7, %s4004_s0  ;;  %v3486_v10 = vpop.f32.mrb[21].mxu0 }
 0x120   :  { %v3487_v11 = vadd.f32 %v3486_v10, %v3485_v8  ;;  %v3550_v12 = vpop.f32.mrb[21].mxu1  ;;  %v3488_v15 = vpop.f32.mrb[22].mxu0 }
 0x121   :  { %v3551_v16 = vadd.f32 %v3550_v12, %v3549_v9  ;;  %v3552_v17 = vpop.f32.mrb[22].mxu1  ;;  %v3489_v18 = vpop.f32.mrb[23].mxu0 }
 0x122   :  { %v3490_v19 = vadd.f32 %v3489_v18, %v3488_v15  ;;  %v3553_v20 = vpop.f32.mrb[23].mxu1 }
 0x123   :  { %v4268_v21 = vadd.f32 %v3551_v16, %v3487_v11  ;;  %v3554_v22 = vadd.f32 %v3553_v20, %v3552_v17 }
 0x125   :  { %v4270_v23 = vadd.f32 %v3554_v22, %v3490_v19  ;;  %1433 = vrot.lane.b32.xlu0 %v4268_v21, %s4004_s0 }
 0x126   :  { %v3491_v24 = vpop.f32.mrb[24].mxu0 }
 0x127   :  { %v3555_v25 = vpop.f32.mrb[24].mxu1  ;;  %1510 = vrot.lane.b32.xlu1 %v4270_v23, %s4004_s0  ;;  %v3492_v26 = vpop.f32.mrb[25].mxu0 }
 0x128   :  { %v3493_v29 = vadd.f32 %v3492_v26, %v3491_v24  ;;  %v3556_v30 = vpop.f32.mrb[25].mxu1  ;;  %v3494_v31 = vpop.f32.mrb[26].mxu0 }
 0x129   :  { %v3557_v32 = vadd.f32 %v3556_v30, %v3555_v25  ;;  %v3558_v33 = vpop.f32.mrb[26].mxu1  ;;  %v3495_v34 = vpop.f32.mrb[27].mxu0 }
 0x12a   :  { %v3496_v35 = vadd.f32 %v3495_v34, %v3494_v31  ;;  %v3559_v36 = vpop.f32.mrb[27].mxu1 }
 0x12b   :  { %v4276_v37 = vadd.f32 %v3557_v32, %v3493_v29  ;;  %v3560_v38 = vadd.f32 %v3559_v36, %v3558_v33 }
 0x12d   :  { %v4278_v39 = vadd.f32 %v3560_v38, %v3496_v35  ;;  %1587 = vrot.lane.b32.xlu0 %v4276_v37, %s4004_s0 }
 0x12e   :  { %v3497_v41 = vpop.f32.mrb[28].mxu0 }
 0x12f   :  { %v3561_v43 = vpop.f32.mrb[28].mxu1  ;;  %1664 = vrot.lane.b32.xlu1 %v4278_v39, %s4004_s0  ;;  %v3498_v44 = vpop.f32.mrb[29].mxu0 }
 0x130   :  { %v3499_v45 = vadd.f32 %v3498_v44, %v3497_v41  ;;  %v3562_v46 = vpop.f32.mrb[29].mxu1  ;;  %v3500_v47 = vpop.f32.mrb[30].mxu0 }
 0x131   :  { %v3563_v48 = vadd.f32 %v3562_v46, %v3561_v43  ;;  %v3564_v49 = vpop.f32.mrb[30].mxu1  ;;  %v3501_v50 = vpop.f32.mrb[31].mxu0 }
 0x132   :  { %v3502_v51 = vadd.f32 %v3501_v50, %v3500_v47  ;;  %v3565_v52 = vpop.f32.mrb[31].mxu1 }
 0x133   :  { %v4284_v53 = vadd.f32 %v3563_v48, %v3499_v45  ;;  %v3566_v55 = vadd.f32 %v3565_v52, %v3564_v49  ;;  %v4404_v48 = vld [vmem:[%s4715_s3] sm:$0xff] }
 0x135   :  { %v4286_v57 = vadd.f32 %v3566_v55, %v3502_v51  ;;  %1741 = vrot.lane.b32.xlu0 %v4284_v53, %s4004_s0 }
 0x137   :  { %1818 = vrot.lane.b32.xlu1 %v4286_v57, %s4004_s0 }
 0x16f   :  { %v663_v58 = vpop.permute.xlu0 %662 }
 0x170   :  { %3632 = vmatpush3.xpose.msk.msra.mxu0 %vm664_vm1, %v663_v58 }
 0x171   :  { %3641 = vmatprep.subr.mxu0 %v4002_v0 }
 0x173   :  { %3634 = vmatmul.mubr.msk.f32.vlgmr.msra.gmra.mrb[32].mxu0 %vm664_vm1, %v4228_v13  ;;  %v741_v59 = vpop.permute.xlu0 %740 }
 0x174   :  { %3637 = vmatpush3.xpose.msk.msra.mxu1 %vm664_vm1, %v741_v59  ;;  %3643 = vmatprep.mubr.msk.f32.mxu0 %vm4003_vm0, %v4002_v0 }
 0x175   :  { %3646 = vmatprep.subr.mxu1 %v4002_v0 }
 0x177   :  { %v818_v60 = vpop.permute.xlu1 %817  ;;  %3639 = vmatmul.mubr.msk.f32.vlgmr.msra.gmra.mrb[32].mxu1 %vm664_vm1, %v4230_v14 }
 0x178   :  { %3642 = vmatpush3.xpose.msk.msra.mxu0 %vm664_vm1, %v818_v60  ;;  %3648 = vmatprep.mubr.msk.f32.mxu1 %vm4003_vm0, %v4002_v0 }
 0x179   :  { %3651 = vmatprep.subr.mxu0 %v4002_v0 }
 0x17b   :  { %v895_v13 = vpop.permute.xlu1 %894  ;;  %3644 = vmatmul.mubr.msk.f32.vlgmr.msra.gmra.mrb[34].mxu0 %vm664_vm1, %v4236_v27 }
 0x17c   :  { %3647 = vmatpush3.xpose.msk.msra.mxu1 %vm664_vm1, %v895_v13  ;;  %3653 = vmatprep.mubr.msk.f32.mxu0 %vm4003_vm0, %v4002_v0 }
 0x17d   :  { %3656 = vmatprep.subr.mxu1 %v4002_v0 }
 0x17f   :  { %3649 = vmatmul.mubr.msk.f32.vlgmr.msra.gmra.mrb[34].mxu1 %vm664_vm1, %v4238_v28  ;;  %v972_v14 = vpop.permute.xlu0 %971 }
 0x180   :  { %3652 = vmatpush3.xpose.msk.msra.mxu0 %vm664_vm1, %v972_v14  ;;  %3658 = vmatprep.mubr.msk.f32.mxu1 %vm4003_vm0, %v4002_v0 }
 0x181   :  { %v1049_v61 = vpop.permute.xlu1 %1048  ;;  %3661 = vmatprep.subr.mxu0 %v4002_v0 }
 0x182   :  { %3657 = vmatpush3.xpose.msk.msra.mxu1 %vm664_vm1, %v1049_v61 }
 0x183   :  { %3654 = vmatmul.mubr.msk.f32.vlgmr.msra.gmra.mrb[36].mxu0 %vm664_vm1, %v4244_v40  ;;  %3666 = vmatprep.subr.mxu1 %v4002_v0 }
 0x184   :  { %3663 = vmatprep.mubr.msk.f32.mxu0 %vm4003_vm0, %v4002_v0 }
 0x185   :  { %3659 = vmatmul.mubr.msk.f32.vlgmr.msra.gmra.mrb[36].mxu1 %vm664_vm1, %v4246_v42 }
 0x186   :  { %3668 = vmatprep.mubr.msk.f32.mxu1 %vm4003_vm0, %v4002_v0 }
 0x187   :  { %v1126_v27 = vpop.permute.xlu0 %1125 }
 0x188   :  { %3662 = vmatpush3.xpose.msk.msra.mxu0 %vm664_vm1, %v1126_v27 }
 0x189   :  { %v1203_v28 = vpop.permute.xlu1 %1202  ;;  %3671 = vmatprep.subr.mxu0 %v4002_v0 }
 0x18a   :  { %3667 = vmatpush3.xpose.msk.msra.mxu1 %vm664_vm1, %v1203_v28 }
 0x18b   :  { %3664 = vmatmul.mubr.msk.f32.vlgmr.msra.gmra.mrb[38].mxu0 %vm664_vm1, %v4252_v54  ;;  %3676 = vmatprep.subr.mxu1 %v4002_v0 }
 0x18c   :  { %3673 = vmatprep.mubr.msk.f32.mxu0 %vm4003_vm0, %v4002_v0 }
 0x18d   :  { %3669 = vmatmul.mubr.msk.f32.vlgmr.msra.gmra.mrb[38].mxu1 %vm664_vm1, %v4254_v56 }
 0x18e   :  { %3678 = vmatprep.mubr.msk.f32.mxu1 %vm4003_vm0, %v4002_v0 }
 0x18f   :  { %v1280_v40 = vpop.permute.xlu0 %1279 }
 0x190   :  { %3672 = vmatpush3.xpose.msk.msra.mxu0 %vm664_vm1, %v1280_v40 }
 0x191   :  { %v1357_v42 = vpop.permute.xlu1 %1356  ;;  %3681 = vmatprep.subr.mxu0 %v4002_v0 }
 0x192   :  { %3677 = vmatpush3.xpose.msk.msra.mxu1 %vm664_vm1, %v1357_v42 }
 0x193   :  { %3674 = vmatmul.mubr.msk.f32.vlgmr.msra.gmra.mrb[40].mxu0 %vm664_vm1, %v4260_v5  ;;  %3686 = vmatprep.subr.mxu1 %v4002_v0 }
 0x194   :  { %3683 = vmatprep.mubr.msk.f32.mxu0 %vm4003_vm0, %v4002_v0 }
 0x195   :  { %3679 = vmatmul.mubr.msk.f32.vlgmr.msra.gmra.mrb[40].mxu1 %vm664_vm1, %v4262_v7 }
 0x196   :  { %3688 = vmatprep.mubr.msk.f32.mxu1 %vm4003_vm0, %v4002_v0 }
 0x197   :  { %v1434_v54 = vpop.permute.xlu0 %1433 }
 0x198   :  { %3682 = vmatpush3.xpose.msk.msra.mxu0 %vm664_vm1, %v1434_v54 }
 0x199   :  { %v1511_v56 = vpop.permute.xlu1 %1510  ;;  %3691 = vmatprep.subr.mxu0 %v4002_v0 }
 0x19a   :  { %3687 = vmatpush3.xpose.msk.msra.mxu1 %vm664_vm1, %v1511_v56 }
 0x19b   :  { %3684 = vmatmul.mubr.msk.f32.vlgmr.msra.gmra.mrb[42].mxu0 %vm664_vm1, %v4268_v21  ;;  %3696 = vmatprep.subr.mxu1 %v4002_v0 }
 0x19c   :  { %3693 = vmatprep.mubr.msk.f32.mxu0 %vm4003_vm0, %v4002_v0 }
 0x19d   :  { %3689 = vmatmul.mubr.msk.f32.vlgmr.msra.gmra.mrb[42].mxu1 %vm664_vm1, %v4270_v23 }
 0x19e   :  { %3698 = vmatprep.mubr.msk.f32.mxu1 %vm4003_vm0, %v4002_v0 }
 0x19f   :  { %v1588_v62 = vpop.permute.xlu0 %1587 }
 0x1a0   :  { %3692 = vmatpush3.xpose.msk.msra.mxu0 %vm664_vm1, %v1588_v62 }
 0x1a1   :  { %v1665_v63 = vpop.permute.xlu1 %1664  ;;  %3701 = vmatprep.subr.mxu0 %v4002_v0 }
 0x1a2   :  { %3697 = vmatpush3.xpose.msk.msra.mxu1 %vm664_vm1, %v1665_v63 }
 0x1a3   :  { %3694 = vmatmul.mubr.msk.f32.vlgmr.msra.gmra.mrb[44].mxu0 %vm664_vm1, %v4276_v37  ;;  %3706 = vmatprep.subr.mxu1 %v4002_v0 }
 0x1a4   :  { %3703 = vmatprep.mubr.msk.f32.mxu0 %vm4003_vm0, %v4002_v0 }
 0x1a5   :  { %3699 = vmatmul.mubr.msk.f32.vlgmr.msra.gmra.mrb[44].mxu1 %vm664_vm1, %v4278_v39 }
 0x1a6   :  { %3708 = vmatprep.mubr.msk.f32.mxu1 %vm4003_vm0, %v4002_v0 }
 0x1a7   :  { %v1742_v1 = vpop.permute.xlu0 %1741 }
 0x1a8   :  { %3702 = vmatpush3.xpose.msk.msra.mxu0 %vm664_vm1, %v1742_v1 }
 0x1a9   :  { %v1819_v2 = vpop.permute.xlu1 %1818  ;;  %3711 = vmatprep.subr.mxu0 %v4002_v0 }
 0x1aa   :  { %3707 = vmatpush3.xpose.msk.msra.mxu1 %vm664_vm1, %v1819_v2 }
 0x1ab   :  { %3704 = vmatmul.mubr.msk.f32.vlgmr.msra.gmra.mrb[46].mxu0 %vm664_vm1, %v4284_v53  ;;  %3716 = vmatprep.subr.mxu1 %v4002_v0 }
 0x1ac   :  { %3713 = vmatprep.mubr.msk.f32.mxu0 %vm4003_vm0, %v4002_v0 }
 0x1ad   :  { %3709 = vmatmul.mubr.msk.f32.vlgmr.msra.gmra.mrb[46].mxu1 %vm664_vm1, %v4286_v57 }
 0x1ae   :  { %3718 = vmatprep.mubr.msk.f32.mxu1 %vm4003_vm0, %v4002_v0 }
 0x246   :  { %v735_v4 = vpop.f32.mrb[32].mxu0 }
 0x247   :  { %v736_v5 = vadd.f32 %v735_v4, %v4391_v3  ;;  %v3635_v6 = vpop.f32.mrb[33].mxu0 }
 0x249   :  { %v3407_v7 = vmul.f32 -1.442695, %v736_v5 }
 0x24a   :  { %v812_v8 = vpop.f32.mrb[32].mxu1 }
 0x24b   :  { %3874 = vpow2.f32 %v3407_v7  ;;  %v813_v9 = vadd.f32 %v812_v8, %v4391_v3  ;;  %v3640_v10 = vpop.f32.mrb[33].mxu1 }
 0x24d   :  { %v3408_v11 = vmul.f32 -1.442695, %v813_v9 }
 0x24e   :  { %v889_v12 = vpop.f32.mrb[34].mxu0 }
 0x24f   :  { %3876 = vpow2.f32 %v3408_v11  ;;  %v890_v15 = vadd.f32 %v889_v12, %v4391_v3  ;;  %v3645_v16 = vpop.f32.mrb[35].mxu0 }
 0x251   :  { %v3409_v17 = vmul.f32 -1.442695, %v890_v15 }
 0x252   :  { %v966_v18 = vpop.f32.mrb[34].mxu1 }
 0x253   :  { %3878 = vpow2.f32 %v3409_v17  ;;  %v967_v19 = vadd.f32 %v966_v18, %v4391_v3  ;;  %v3650_v20 = vpop.f32.mrb[35].mxu1 }
 0x255   :  { %v3875_v21 = vpop.eup %3874  ;;  %v3410_v22 = vmul.f32 -1.442695, %v967_v19 }
 0x256   :  { %v1942_v23 = vadd.f32 1.0, %v3875_v21  ;;  %v1043_v24 = vpop.f32.mrb[36].mxu0 }
 0x257   :  { %3880 = vpow2.f32 %v3410_v22  ;;  %v1044_v25 = vadd.f32 %v1043_v24, %v4391_v3  ;;  %v3655_v26 = vpop.f32.mrb[37].mxu0 }
 0x258   :  { %3882 = vrcp.f32 %v1942_v23  ;;  %v1120_v29 = vpop.f32.mrb[36].mxu1 }
 0x259   :  { %v3877_v30 = vpop.eup %3876  ;;  %v3411_v31 = vmul.f32 -1.442695, %v1044_v25  ;;  %v1121_v32 = vadd.f32 %v1120_v29, %v4391_v3  ;;  %v3660_v33 = vpop.f32.mrb[37].mxu1 }
 0x25a   :  { %v1943_v34 = vadd.f32 1.0, %v3877_v30 }
 0x25b   :  { %3884 = vpow2.f32 %v3411_v31  ;;  %v3412_v35 = vmul.f32 -1.442695, %v1121_v32 }
 0x25c   :  { %3886 = vrcp.f32 %v1943_v34 }
 0x25d   :  { %v3879_v36 = vpop.eup %3878  ;;  %3888 = vpow2.f32 %v3412_v35 }
 0x25e   :  { %v1944_v37 = vadd.f32 1.0, %v3879_v36  ;;  %v1197_v38 = vpop.f32.mrb[38].mxu0 }
 0x25f   :  { %v1198_v39 = vadd.f32 %v1197_v38, %v4391_v3  ;;  %v3665_v41 = vpop.f32.mrb[39].mxu0 }
 0x260   :  { %3890 = vrcp.f32 %v1944_v37  ;;  %v1274_v43 = vpop.f32.mrb[38].mxu1 }
 0x261   :  { %v3881_v44 = vpop.eup %3880  ;;  %v3413_v45 = vmul.f32 -1.442695, %v1198_v39  ;;  %v1275_v46 = vadd.f32 %v1274_v43, %v4391_v3  ;;  %v3670_v47 = vpop.f32.mrb[39].mxu1 }
 0x262   :  { %v3883_v49 = vpop.eup %3882  ;;  %v1945_v50 = vadd.f32 1.0, %v3881_v44 }
 0x263   :  { %3892 = vpow2.f32 %v3413_v45  ;;  %v3414_v51 = vmul.f32 -1.442695, %v1275_v46  ;;  %3712 = vmatpush3.msra.mxu0 %v3883_v49 }
 0x264   :  { %3894 = vrcp.f32 %v1945_v50  ;;  %3714 = vmatmul.mubr.msk.f32.vlgmr.msra.gmra.mrb[48].mxu0 %vm1991_vm2, %v4404_v48  ;;  %3721 = vmatprep.subr.mxu0 %v4002_v0 }
 0x265   :  { %v3885_v52 = vpop.eup %3884  ;;  %3896 = vpow2.f32 %v3414_v51  ;;  %3723 = vmatprep.mubr.msk.f32.mxu0 %vm4003_vm0, %v4002_v0 }
 0x266   :  { %v3887_v53 = vpop.eup %3886  ;;  %v1946_v55 = vadd.f32 1.0, %v3885_v52  ;;  %v1351_v57 = vpop.f32.mrb[40].mxu0 }
 0x267   :  { %v3889_v58 = vpop.eup %3888  ;;  %v1352_v59 = vadd.f32 %v1351_v57, %v4391_v3  ;;  %v3675_v60 = vpop.f32.mrb[41].mxu0  ;;  %3717 = vmatpush3.msra.mxu1 %v3887_v53 }
 0x268   :  { %3898 = vrcp.f32 %v1946_v55  ;;  %v1947_v13 = vadd.f32 1.0, %v3889_v58  ;;  %v1428_v14 = vpop.f32.mrb[40].mxu1  ;;  %3719 = vmatmul.mubr.msk.f32.vlgmr.msra.gmra.mrb[48].mxu1 %vm1991_vm2, %v4404_v48  ;;  %3726 = vmatprep.subr.mxu1 %v4002_v0 }
 0x269   :  { %v3415_v61 = vmul.f32 -1.442695, %v1352_v59  ;;  %v1429_v27 = vadd.f32 %v1428_v14, %v4391_v3  ;;  %v3680_v28 = vpop.f32.mrb[41].mxu1  ;;  %3728 = vmatprep.mubr.msk.f32.mxu1 %vm4003_vm0, %v4002_v0 }
 0x26a   :  { %v3891_v40 = vpop.eup %3890  ;;  %3900 = vrcp.f32 %v1947_v13 }
 0x26b   :  { %3902 = vpow2.f32 %v3415_v61  ;;  %v3416_v42 = vmul.f32 -1.442695, %v1429_v27  ;;  %3722 = vmatpush3.msra.mxu0 %v3891_v40 }
 0x26c   :  { %3724 = vmatmul.mubr.msk.f32.vlgmr.msra.gmra.mrb[50].mxu0 %vm1991_vm2, %v4404_v48  ;;  %3731 = vmatprep.subr.mxu0 %v4002_v0 }
 0x26d   :  { %v3893_v54 = vpop.eup %3892  ;;  %3904 = vpow2.f32 %v3416_v42  ;;  %3733 = vmatprep.mubr.msk.f32.mxu0 %vm4003_vm0, %v4002_v0 }
 0x26e   :  { %v3895_v56 = vpop.eup %3894  ;;  %v1948_v62 = vadd.f32 1.0, %v3893_v54  ;;  %v1505_v63 = vpop.f32.mrb[42].mxu0 }
 0x26f   :  { %v3897_v1 = vpop.eup %3896  ;;  %v1506_v2 = vadd.f32 %v1505_v63, %v4391_v3  ;;  %v3685_v4 = vpop.f32.mrb[43].mxu0  ;;  %3727 = vmatpush3.msra.mxu1 %v3895_v56 }
 0x270   :  { %3906 = vrcp.f32 %v1948_v62  ;;  %v1949_v5 = vadd.f32 1.0, %v3897_v1  ;;  %v1582_v6 = vpop.f32.mrb[42].mxu1  ;;  %3729 = vmatmul.mubr.msk.f32.vlgmr.msra.gmra.mrb[50].mxu1 %vm1991_vm2, %v4404_v48  ;;  %3736 = vmatprep.subr.mxu1 %v4002_v0 }
 0x271   :  { %v3417_v7 = vmul.f32 -1.442695, %v1506_v2  ;;  %v1583_v8 = vadd.f32 %v1582_v6, %v4391_v3  ;;  %v3690_v9 = vpop.f32.mrb[43].mxu1  ;;  %3738 = vmatprep.mubr.msk.f32.mxu1 %vm4003_vm0, %v4002_v0 }
 0x272   :  { %v3899_v10 = vpop.eup %3898  ;;  %3908 = vrcp.f32 %v1949_v5 }
 0x273   :  { %3910 = vpow2.f32 %v3417_v7  ;;  %v3418_v11 = vmul.f32 -1.442695, %v1583_v8  ;;  %3732 = vmatpush3.msra.mxu0 %v3899_v10 }
 0x274   :  { %v3901_v12 = vpop.eup %3900  ;;  %3734 = vmatmul.mubr.msk.f32.vlgmr.msra.gmra.mrb[52].mxu0 %vm1991_vm2, %v4404_v48  ;;  %3741 = vmatprep.subr.mxu0 %v4002_v0 }
 0x275   :  { %v3903_v15 = vpop.eup %3902  ;;  %3912 = vpow2.f32 %v3418_v11  ;;  %3737 = vmatpush3.msra.mxu1 %v3901_v12  ;;  %3743 = vmatprep.mubr.msk.f32.mxu0 %vm4003_vm0, %v4002_v0 }
 0x276   :  { %v1950_v16 = vadd.f32 1.0, %v3903_v15  ;;  %v1659_v17 = vpop.f32.mrb[44].mxu0  ;;  %3739 = vmatmul.mubr.msk.f32.vlgmr.msra.gmra.mrb[52].mxu1 %vm1991_vm2, %v4404_v48  ;;  %3746 = vmatprep.subr.mxu1 %v4002_v0 }
 0x277   :  { %v3905_v18 = vpop.eup %3904  ;;  %v1660_v19 = vadd.f32 %v1659_v17, %v4391_v3  ;;  %v3695_v20 = vpop.f32.mrb[45].mxu0  ;;  %3748 = vmatprep.mubr.msk.f32.mxu1 %vm4003_vm0, %v4002_v0 }
 0x278   :  { %3914 = vrcp.f32 %v1950_v16  ;;  %v1951_v21 = vadd.f32 1.0, %v3905_v18  ;;  %v1736_v22 = vpop.f32.mrb[44].mxu1 }
 0x279   :  { %v3419_v23 = vmul.f32 -1.442695, %v1660_v19  ;;  %v1737_v24 = vadd.f32 %v1736_v22, %v4391_v3  ;;  %v3700_v25 = vpop.f32.mrb[45].mxu1 }
 0x27a   :  { %v3907_v26 = vpop.eup %3906  ;;  %3916 = vrcp.f32 %v1951_v21 }
 0x27b   :  { %3918 = vpow2.f32 %v3419_v23  ;;  %v3420_v29 = vmul.f32 -1.442695, %v1737_v24  ;;  %3742 = vmatpush3.msra.mxu0 %v3907_v26 }
 0x27c   :  { %v3909_v30 = vpop.eup %3908  ;;  %3744 = vmatmul.mubr.msk.f32.vlgmr.msra.gmra.mrb[54].mxu0 %vm1991_vm2, %v4404_v48  ;;  %3751 = vmatprep.subr.mxu0 %v4002_v0 }
 0x27d   :  { %v3911_v31 = vpop.eup %3910  ;;  %3920 = vpow2.f32 %v3420_v29  ;;  %3747 = vmatpush3.msra.mxu1 %v3909_v30  ;;  %3753 = vmatprep.mubr.msk.f32.mxu0 %vm4003_vm0, %v4002_v0 }
 0x27e   :  { %v1952_v32 = vadd.f32 1.0, %v3911_v31  ;;  %v1813_v33 = vpop.f32.mrb[46].mxu0  ;;  %3749 = vmatmul.mubr.msk.f32.vlgmr.msra.gmra.mrb[54].mxu1 %vm1991_vm2, %v4404_v48  ;;  %3756 = vmatprep.subr.mxu1 %v4002_v0 }
 0x27f   :  { %v3913_v34 = vpop.eup %3912  ;;  %v1814_v35 = vadd.f32 %v1813_v33, %v4391_v3  ;;  %v3705_v36 = vpop.f32.mrb[47].mxu0  ;;  %3758 = vmatprep.mubr.msk.f32.mxu1 %vm4003_vm0, %v4002_v0 }
 0x280   :  { %3922 = vrcp.f32 %v1952_v32  ;;  %v1953_v37 = vadd.f32 1.0, %v3913_v34  ;;  %v1890_v38 = vpop.f32.mrb[46].mxu1 }
 0x281   :  { %v3421_v39 = vmul.f32 -1.442695, %v1814_v35  ;;  %v1891_v41 = vadd.f32 %v1890_v38, %v4391_v3  ;;  %v3710_v43 = vpop.f32.mrb[47].mxu1 }
 0x282   :  { %v3915_v44 = vpop.eup %3914  ;;  %3924 = vrcp.f32 %v1953_v37 }
 0x283   :  { %3926 = vpow2.f32 %v3421_v39  ;;  %v3422_v45 = vmul.f32 -1.442695, %v1891_v41  ;;  %3752 = vmatpush3.msra.mxu0 %v3915_v44 }
 0x284   :  { %v3917_v46 = vpop.eup %3916  ;;  %3754 = vmatmul.mubr.msk.f32.vlgmr.msra.gmra.mrb[56].mxu0 %vm1991_vm2, %v4404_v48  ;;  %3761 = vmatprep.subr.mxu0 %v4002_v0 }
 0x285   :  { %v3919_v47 = vpop.eup %3918  ;;  %3928 = vpow2.f32 %v3422_v45  ;;  %3757 = vmatpush3.msra.mxu1 %v3917_v46  ;;  %3763 = vmatprep.mubr.msk.f32.mxu0 %vm4003_vm0, %v4002_v0 }
 0x286   :  { %v1954_v49 = vadd.f32 1.0, %v3919_v47  ;;  %3759 = vmatmul.mubr.msk.f32.vlgmr.msra.gmra.mrb[56].mxu1 %vm1991_vm2, %v4404_v48  ;;  %3766 = vmatprep.subr.mxu1 %v4002_v0 }
 0x287   :  { %v3921_v3 = vpop.eup %3920  ;;  %3768 = vmatprep.mubr.msk.f32.mxu1 %vm4003_vm0, %v4002_v0 }
 0x288   :  { %3930 = vrcp.f32 %v1954_v49  ;;  %v1955_v50 = vadd.f32 1.0, %v3921_v3 }
 0x28a   :  { %v3923_v51 = vpop.eup %3922  ;;  %3932 = vrcp.f32 %v1955_v50 }
 0x28b   :  { %3762 = vmatpush3.msra.mxu0 %v3923_v51 }
 0x28c   :  { %v3925_v52 = vpop.eup %3924  ;;  %3764 = vmatmul.mubr.msk.f32.vlgmr.msra.gmra.mrb[58].mxu0 %vm1991_vm2, %v4404_v48  ;;  %3771 = vmatprep.subr.mxu0 %v4002_v0 }
 0x28d   :  { %v3927_v53 = vpop.eup %3926  ;;  %3767 = vmatpush3.msra.mxu1 %v3925_v52  ;;  %3773 = vmatprep.mubr.msk.f32.mxu0 %vm4003_vm0, %v4002_v0 }
 0x28e   :  { %v1956_v55 = vadd.f32 1.0, %v3927_v53  ;;  %3769 = vmatmul.mubr.msk.f32.vlgmr.msra.gmra.mrb[58].mxu1 %vm1991_vm2, %v4404_v48  ;;  %3776 = vmatprep.subr.mxu1 %v4002_v0 }
 0x28f   :  { %v3929_v57 = vpop.eup %3928  ;;  %3778 = vmatprep.mubr.msk.f32.mxu1 %vm4003_vm0, %v4002_v0 }
 0x290   :  { %3934 = vrcp.f32 %v1956_v55  ;;  %v1957_v58 = vadd.f32 1.0, %v3929_v57 }
 0x292   :  { %v3931_v59 = vpop.eup %3930  ;;  %3936 = vrcp.f32 %v1957_v58 }
 0x293   :  { %3772 = vmatpush3.msra.mxu0 %v3931_v59 }
 0x294   :  { %v3933_v60 = vpop.eup %3932  ;;  %3774 = vmatmul.mubr.msk.f32.vlgmr.msra.gmra.mrb[60].mxu0 %vm1991_vm2, %v4404_v48  ;;  %3781 = vmatprep.subr.mxu0 %v4002_v0 }
 0x295   :  { %3777 = vmatpush3.msra.mxu1 %v3933_v60  ;;  %3783 = vmatprep.mubr.msk.f32.mxu0 %vm4003_vm0, %v4002_v0 }
 0x296   :  { %3779 = vmatmul.mubr.msk.f32.vlgmr.msra.gmra.mrb[60].mxu1 %vm1991_vm2, %v4404_v48  ;;  %3786 = vmatprep.subr.mxu1 %v4002_v0 }
 0x297   :  { %3788 = vmatprep.mubr.msk.f32.mxu1 %vm4003_vm0, %v4002_v0 }
 0x29a   :  { %v3935_v13 = vpop.eup %3934 }
 0x29b   :  { %3782 = vmatpush3.msra.mxu0 %v3935_v13 }
 0x29c   :  { %v3937_v14 = vpop.eup %3936  ;;  %3784 = vmatmul.mubr.msk.f32.vlgmr.msra.gmra.mrb[62].mxu0 %vm1991_vm2, %v4404_v48 }
 0x29d   :  { %3787 = vmatpush3.msra.mxu1 %v3937_v14 }
 0x29e   :  { %3789 = vmatmul.mubr.msk.f32.vlgmr.msra.gmra.mrb[62].mxu1 %vm1991_vm2, %v4404_v48 }
 0x337   :  { %v4488_v61 = vpop.f32.mrb[48].mxu0 }
 0x338   :  { %v3115_v27 = vsel %vm1991_vm2, %v4488_v61, -inf  ;;  %v3715_v28 = vpop.f32.mrb[49].mxu0 }
 0x339   :  { %3116 = vmax.xlane.f32.xlu0 %v3115_v27 }
 0x33b   :  { %v4492_v40 = vpop.f32.mrb[48].mxu1 }
 0x33c   :  { %v3118_v0 = vsel %vm1991_vm2, %v4492_v40, -inf  ;;  %v3720_v42 = vpop.f32.mrb[49].mxu1 }
 0x33d   :  { %3119 = vmax.xlane.f32.xlu1 %v3118_v0 }
 0x33f   :  { %v4496_v54 = vpop.f32.mrb[50].mxu0 }
 0x340   :  { %v3121_v56 = vsel %vm1991_vm2, %v4496_v54, -inf  ;;  %v3725_v48 = vpop.f32.mrb[51].mxu0 }
 0x341   :  { %3122 = vmax.xlane.f32.xlu0 %v3121_v56 }
 0x343   :  { %v4500_v62 = vpop.f32.mrb[50].mxu1 }
 0x344   :  { %v3124_v63 = vsel %vm1991_vm2, %v4500_v62, -inf  ;;  %v3730_v1 = vpop.f32.mrb[51].mxu1 }
 0x345   :  { %3125 = vmax.xlane.f32.xlu0 %v3124_v63 }
 0x347   :  { %v4504_v2 = vpop.f32.mrb[52].mxu0 }
 0x348   :  { %v3127_v4 = vsel %vm1991_vm2, %v4504_v2, -inf  ;;  %v3735_v5 = vpop.f32.mrb[53].mxu0 }
 0x349   :  { %v4508_v6 = vpop.f32.mrb[52].mxu1  ;;  %3128 = vmax.xlane.f32.xlu1 %v3127_v4 }
 0x34a   :  { %v3130_v7 = vsel %vm1991_vm2, %v4508_v6, -inf  ;;  %v3740_v8 = vpop.f32.mrb[53].mxu1 }
 0x34b   :  { %3131 = vmax.xlane.f32.xlu0 %v3130_v7 }
 0x34f   :  { %v4512_v9 = vpop.f32.mrb[54].mxu0 }
 0x350   :  { %v3133_v10 = vsel %vm1991_vm2, %v4512_v9, -inf  ;;  %v3745_v11 = vpop.f32.mrb[55].mxu0 }
 0x351   :  { %v4516_v12 = vpop.f32.mrb[54].mxu1  ;;  %3134 = vmax.xlane.f32.xlu1 %v3133_v10 }
 0x352   :  { %v3136_v15 = vsel %vm1991_vm2, %v4516_v12, -inf  ;;  %v3750_v16 = vpop.f32.mrb[55].mxu1 }
 0x353   :  { %3137 = vmax.xlane.f32.xlu0 %v3136_v15 }
 0x357   :  { %v4520_v17 = vpop.f32.mrb[56].mxu0 }
 0x358   :  { %v3139_v18 = vsel %vm1991_vm2, %v4520_v17, -inf  ;;  %v3755_v19 = vpop.f32.mrb[57].mxu0 }
 0x359   :  { %v4524_v20 = vpop.f32.mrb[56].mxu1  ;;  %3140 = vmax.xlane.f32.xlu1 %v3139_v18 }
 0x35a   :  { %v3142_v21 = vsel %vm1991_vm2, %v4524_v20, -inf  ;;  %v3760_v22 = vpop.f32.mrb[57].mxu1 }
 0x35b   :  { %3143 = vmax.xlane.f32.xlu0 %v3142_v21 }
 0x35f   :  { %v4528_v23 = vpop.f32.mrb[58].mxu0 }
 0x360   :  { %v3145_v24 = vsel %vm1991_vm2, %v4528_v23, -inf  ;;  %v3765_v25 = vpop.f32.mrb[59].mxu0 }
 0x361   :  { %v4532_v26 = vpop.f32.mrb[58].mxu1  ;;  %3146 = vmax.xlane.f32.xlu1 %v3145_v24 }
 0x362   :  { %v3148_v29 = vsel %vm1991_vm2, %v4532_v26, -inf  ;;  %v3770_v30 = vpop.f32.mrb[59].mxu1 }
 0x363   :  { %3149 = vmax.xlane.f32.xlu0 %v3148_v29 }
 0x367   :  { %v4536_v31 = vpop.f32.mrb[60].mxu0 }
 0x368   :  { %v3151_v32 = vsel %vm1991_vm2, %v4536_v31, -inf  ;;  %v3775_v33 = vpop.f32.mrb[61].mxu0 }
 0x369   :  { %v4540_v34 = vpop.f32.mrb[60].mxu1  ;;  %3152 = vmax.xlane.f32.xlu1 %v3151_v32 }
 0x36a   :  { %v3154_v35 = vsel %vm1991_vm2, %v4540_v34, -inf  ;;  %v3780_v36 = vpop.f32.mrb[61].mxu1 }
 0x36b   :  { %3155 = vmax.xlane.f32.xlu0 %v3154_v35 }
 0x36f   :  { %v4544_v37 = vpop.f32.mrb[62].mxu0 }
 0x370   :  { %v3157_v38 = vsel %vm1991_vm2, %v4544_v37, -inf  ;;  %v3785_v39 = vpop.f32.mrb[63].mxu0 }
 0x371   :  { %v4548_v41 = vpop.f32.mrb[62].mxu1  ;;  %3158 = vmax.xlane.f32.xlu1 %v3157_v38 }
 0x372   :  { %v3160_v43 = vsel %vm1991_vm2, %v4548_v41, -inf  ;;  %v3790_v44 = vpop.f32.mrb[63].mxu1 }
 0x373   :  { %3161 = vmax.xlane.f32.xlu0 %v3160_v43 }
 0x3c6   :  { %v3117_v45 = vpop.xlane.xlu0 %3116 }
 0x3c7   :  { %v3163_v46 = vsub.f32 %v4488_v61, %v3117_v45 }
 0x3c9   :  { %v3179_v47 = vmul.f32 1.442695, %v3163_v46 }
 0x3ca   :  { %v3120_v49 = vpop.xlane.xlu1 %3119 }
 0x3cb   :  { %3938 = vpow2.f32 %v3179_v47  ;;  %v3164_v3 = vsub.f32 %v4492_v40, %v3120_v49 }
 0x3cd   :  { %v3181_v50 = vmul.f32 1.442695, %v3164_v3 }
 0x3ce   :  { %v3123_v51 = vpop.xlane.xlu0 %3122 }
 0x3cf   :  { %3940 = vpow2.f32 %v3181_v50  ;;  %v3165_v52 = vsub.f32 %v4496_v54, %v3123_v51 }
 0x3d1   :  { %v3183_v53 = vmul.f32 1.442695, %v3165_v52 }
 0x3d2   :  { %v3126_v55 = vpop.xlane.xlu0 %3125 }
 0x3d3   :  { %3942 = vpow2.f32 %v3183_v53  ;;  %v3166_v57 = vsub.f32 %v4500_v62, %v3126_v55 }
 0x3d5   :  { %v4556_v58 = vpop.eup %3938  ;;  %v3185_v59 = vmul.f32 1.442695, %v3166_v57 }
 0x3d6   :  { %v3129_v60 = vpop.xlane.xlu1 %3128  ;;  %v3211_v13 = vsel %vm1991_vm2, %v4556_v58, 0.0 }
 0x3d7   :  { %3944 = vpow2.f32 %v3185_v59  ;;  %v3167_v14 = vsub.f32 %v4504_v2, %v3129_v60  ;;  %3212 = vadd.xlane.f32.xlu1 %v3211_v13 }
 0x3d8   :  { %v3132_v61 = vpop.xlane.xlu0 %3131 }
 0x3d9   :  { %v4561_v27 = vpop.eup %3940  ;;  %v3187_v28 = vmul.f32 1.442695, %v3167_v14  ;;  %v3168_v40 = vsub.f32 %v4508_v6, %v3132_v61 }
 0x3da   :  { %v3214_v0 = vsel %vm1991_vm2, %v4561_v27, 0.0 }
 0x3db   :  { %3946 = vpow2.f32 %v3187_v28  ;;  %v3189_v42 = vmul.f32 1.442695, %v3168_v40  ;;  %3215 = vadd.xlane.f32.xlu0 %v3214_v0 }
 0x3dd   :  { %v4566_v54 = vpop.eup %3942  ;;  %3948 = vpow2.f32 %v3189_v42 }
 0x3de   :  { %v3135_v56 = vpop.xlane.xlu1 %3134  ;;  %v3217_v48 = vsel %vm1991_vm2, %v4566_v54, 0.0 }
 0x3df   :  { %v3169_v62 = vsub.f32 %v4512_v9, %v3135_v56  ;;  %3218 = vadd.xlane.f32.xlu1 %v3217_v48 }
 0x3e0   :  { %v3138_v63 = vpop.xlane.xlu0 %3137 }
 0x3e1   :  { %v4571_v1 = vpop.eup %3944  ;;  %v3191_v2 = vmul.f32 1.442695, %v3169_v62  ;;  %v3170_v4 = vsub.f32 %v4516_v12, %v3138_v63 }
 0x3e2   :  { %v3220_v5 = vsel %vm1991_vm2, %v4571_v1, 0.0 }
 0x3e3   :  { %3950 = vpow2.f32 %v3191_v2  ;;  %v3193_v6 = vmul.f32 1.442695, %v3170_v4  ;;  %3221 = vadd.xlane.f32.xlu0 %v3220_v5 }
 0x3e5   :  { %v4576_v7 = vpop.eup %3946  ;;  %3952 = vpow2.f32 %v3193_v6 }
 0x3e6   :  { %v3141_v8 = vpop.xlane.xlu1 %3140  ;;  %v3223_v9 = vsel %vm1991_vm2, %v4576_v7, 0.0 }
 0x3e7   :  { %v4580_v10 = vpop.eup %3948  ;;  %v3171_v11 = vsub.f32 %v4520_v17, %v3141_v8  ;;  %3224 = vadd.xlane.f32.xlu1 %v3223_v9 }
 0x3e8   :  { %v3144_v15 = vpop.xlane.xlu0 %3143  ;;  %v3226_v12 = vsel %vm1991_vm2, %v4580_v10, 0.0 }
 0x3e9   :  { %v3195_v16 = vmul.f32 1.442695, %v3171_v11  ;;  %v3172_v18 = vsub.f32 %v4524_v20, %v3144_v15  ;;  %3227 = vadd.xlane.f32.xlu0 %v3226_v12 }
 0x3eb   :  { %3954 = vpow2.f32 %v3195_v16  ;;  %v3197_v19 = vmul.f32 1.442695, %v3172_v18 }
 0x3ed   :  { %v4586_v21 = vpop.eup %3950  ;;  %3956 = vpow2.f32 %v3197_v19 }
 0x3ee   :  { %v3147_v22 = vpop.xlane.xlu1 %3146  ;;  %v3229_v24 = vsel %vm1991_vm2, %v4586_v21, 0.0 }
 0x3ef   :  { %v4590_v25 = vpop.eup %3952  ;;  %v3173_v17 = vsub.f32 %v4528_v23, %v3147_v22  ;;  %3230 = vadd.xlane.f32.xlu1 %v3229_v24 }
 0x3f0   :  { %v3150_v29 = vpop.xlane.xlu0 %3149  ;;  %v3232_v30 = vsel %vm1991_vm2, %v4590_v25, 0.0 }
 0x3f1   :  { %v3199_v20 = vmul.f32 1.442695, %v3173_v17  ;;  %v3174_v32 = vsub.f32 %v4532_v26, %v3150_v29  ;;  %3233 = vadd.xlane.f32.xlu0 %v3232_v30 }
 0x3f3   :  { %3958 = vpow2.f32 %v3199_v20  ;;  %v3201_v33 = vmul.f32 1.442695, %v3174_v32 }
 0x3f5   :  { %v4596_v35 = vpop.eup %3954  ;;  %3960 = vpow2.f32 %v3201_v33 }
 0x3f6   :  { %v3153_v36 = vpop.xlane.xlu1 %3152  ;;  %v3235_v38 = vsel %vm1991_vm2, %v4596_v35, 0.0 }
 0x3f7   :  { %v4600_v39 = vpop.eup %3956  ;;  %v3175_v23 = vsub.f32 %v4536_v31, %v3153_v36  ;;  %3236 = vadd.xlane.f32.xlu1 %v3235_v38 }
 0x3f8   :  { %v3156_v43 = vpop.xlane.xlu0 %3155  ;;  %v3238_v44 = vsel %vm1991_vm2, %v4600_v39, 0.0 }
 0x3f9   :  { %v3203_v26 = vmul.f32 1.442695, %v3175_v23  ;;  %v3176_v45 = vsub.f32 %v4540_v34, %v3156_v43  ;;  %3239 = vadd.xlane.f32.xlu0 %v3238_v44 }
 0x3fb   :  { %3962 = vpow2.f32 %v3203_v26  ;;  %v3205_v46 = vmul.f32 1.442695, %v3176_v45 }
 0x3fd   :  { %v4606_v47 = vpop.eup %3958  ;;  %3964 = vpow2.f32 %v3205_v46 }
 0x3fe   :  { %v3159_v49 = vpop.xlane.xlu1 %3158  ;;  %v3241_v3 = vsel %vm1991_vm2, %v4606_v47, 0.0 }
 0x3ff   :  { %v4610_v50 = vpop.eup %3960  ;;  %v3177_v31 = vsub.f32 %v4544_v37, %v3159_v49  ;;  %3242 = vadd.xlane.f32.xlu1 %v3241_v3 }
 0x400   :  { %v3162_v51 = vpop.xlane.xlu0 %3161  ;;  %v3244_v52 = vsel %vm1991_vm2, %v4610_v50, 0.0 }
 0x401   :  { %v3207_v34 = vmul.f32 1.442695, %v3177_v31  ;;  %v3178_v53 = vsub.f32 %v4548_v41, %v3162_v51  ;;  %3245 = vadd.xlane.f32.xlu0 %v3244_v52 }
 0x403   :  { %3966 = vpow2.f32 %v3207_v34  ;;  %v3209_v55 = vmul.f32 1.442695, %v3178_v53 }
 0x405   :  { %v4616_v57 = vpop.eup %3962  ;;  %3968 = vpow2.f32 %v3209_v55 }
 0x406   :  { %v3247_v59 = vsel %vm1991_vm2, %v4616_v57, 0.0 }
 0x407   :  { %v4620_v60 = vpop.eup %3964  ;;  %3248 = vadd.xlane.f32.xlu1 %v3247_v59 }
 0x408   :  { %v3250_v37 = vsel %vm1991_vm2, %v4620_v60, 0.0 }
 0x409   :  { %3251 = vadd.xlane.f32.xlu0 %v3250_v37 }
 0x40d   :  { %v4624_v13 = vpop.eup %3966 }
 0x40e   :  { %v3253_v41 = vsel %vm1991_vm2, %v4624_v13, 0.0 }
 0x40f   :  { %v4628_v14 = vpop.eup %3968  ;;  %3254 = vadd.xlane.f32.xlu1 %v3253_v41 }
 0x410   :  { %v3256_v61 = vsel %vm1991_vm2, %v4628_v14, 0.0 }
 0x411   :  { %3257 = vadd.xlane.f32.xlu0 %v3256_v61 }
 0x464   :  { %v3213_v28 = vpop.xlane.xlu1 %3212 }
 0x465   :  { %3970 = vrcp.f32 %v3213_v28 }
 0x468   :  { %v3216_v40 = vpop.xlane.xlu0 %3215 }
 0x469   :  { %3972 = vrcp.f32 %v3216_v40 }
 0x46c   :  { %v3219_v0 = vpop.xlane.xlu1 %3218 }
 0x46d   :  { %3974 = vrcp.f32 %v3219_v0 }
 0x46f   :  { %v3971_v42 = vpop.eup %3970 }
 0x470   :  { %v3275_v56 = vmul.f32 %v3971_v42, %v4556_v58  ;;  %v3222_v48 = vpop.xlane.xlu0 %3221 }
 0x471   :  { %3976 = vrcp.f32 %v3222_v48 }
 0x472   :  { %3291 = vst.msk [vmem:[%s4716_s4] sm:$0xff] %vm1991_vm2, %v3275_v56 }
 0x473   :  { %v3973_v62 = vpop.eup %3972 }
 0x474   :  { %v3276_v63 = vmul.f32 %v3973_v62, %v4561_v27  ;;  %v3225_v2 = vpop.xlane.xlu1 %3224 }
 0x475   :  { %3978 = vrcp.f32 %v3225_v2 }
 0x476   :  { %3292 = vst.msk [vmem:[%s4716_s4 + $0x8] sm:$0xff] %vm1991_vm2, %v3276_v63  ;;  %v3228_v4 = vpop.xlane.xlu0 %3227 }
 0x477   :  { %v3975_v5 = vpop.eup %3974  ;;  %3980 = vrcp.f32 %v3228_v4 }
 0x478   :  { %v3277_v58 = vmul.f32 %v3975_v5, %v4566_v54 }
 0x47a   :  { %3293 = vst.msk [vmem:[%s4716_s4 + $0x10] sm:$0xff] %vm1991_vm2, %v3277_v58 }
 0x47b   :  { %v3977_v6 = vpop.eup %3976 }
 0x47c   :  { %v3278_v27 = vmul.f32 %v3977_v6, %v4571_v1  ;;  %v3231_v8 = vpop.xlane.xlu1 %3230 }
 0x47d   :  { %3982 = vrcp.f32 %v3231_v8 }
 0x47e   :  { %3294 = vst.msk [vmem:[%s4716_s4 + $0x18] sm:$0xff] %vm1991_vm2, %v3278_v27  ;;  %v3234_v9 = vpop.xlane.xlu0 %3233 }
 0x47f   :  { %v3979_v11 = vpop.eup %3978  ;;  %3984 = vrcp.f32 %v3234_v9 }
 0x480   :  { %v3279_v54 = vmul.f32 %v3979_v11, %v4576_v7 }
 0x481   :  { %v3981_v15 = vpop.eup %3980 }
 0x482   :  { %3295 = vst.msk [vmem:[%s4716_s4 + $0x20] sm:$0xff] %vm1991_vm2, %v3279_v54  ;;  %v3280_v1 = vmul.f32 %v3981_v15, %v4580_v10 }
 0x484   :  { %3296 = vst.msk [vmem:[%s4716_s4 + $0x28] sm:$0xff] %vm1991_vm2, %v3280_v1  ;;  %v3237_v12 = vpop.xlane.xlu1 %3236 }
 0x485   :  { %3986 = vrcp.f32 %v3237_v12 }
 0x486   :  { %v3240_v16 = vpop.xlane.xlu0 %3239 }
 0x487   :  { %v3983_v18 = vpop.eup %3982  ;;  %3988 = vrcp.f32 %v3240_v16 }
 0x488   :  { %v3281_v7 = vmul.f32 %v3983_v18, %v4586_v21 }
 0x489   :  { %v3985_v19 = vpop.eup %3984 }
 0x48a   :  { %3297 = vst.msk [vmem:[%s4716_s4 + $0x30] sm:$0xff] %vm1991_vm2, %v3281_v7  ;;  %v3282_v10 = vmul.f32 %v3985_v19, %v4590_v25 }
 0x48c   :  { %3298 = vst.msk [vmem:[%s4716_s4 + $0x38] sm:$0xff] %vm1991_vm2, %v3282_v10  ;;  %v3243_v22 = vpop.xlane.xlu1 %3242 }
 0x48d   :  { %3990 = vrcp.f32 %v3243_v22 }
 0x48e   :  { %v3246_v24 = vpop.xlane.xlu0 %3245 }
 0x48f   :  { %v3987_v17 = vpop.eup %3986  ;;  %3992 = vrcp.f32 %v3246_v24 }
 0x490   :  { %v3283_v21 = vmul.f32 %v3987_v17, %v4596_v35 }
 0x491   :  { %v3989_v29 = vpop.eup %3988 }
 0x492   :  { %3299 = vst.msk [vmem:[%s4716_s4 + $0x40] sm:$0xff] %vm1991_vm2, %v3283_v21  ;;  %v3284_v25 = vmul.f32 %v3989_v29, %v4600_v39 }
 0x494   :  { %3300 = vst.msk [vmem:[%s4716_s4 + $0x48] sm:$0xff] %vm1991_vm2, %v3284_v25  ;;  %v3249_v30 = vpop.xlane.xlu1 %3248 }
 0x495   :  { %3994 = vrcp.f32 %v3249_v30 }
 0x496   :  { %v3252_v20 = vpop.xlane.xlu0 %3251 }
 0x497   :  { %v3991_v32 = vpop.eup %3990  ;;  %3996 = vrcp.f32 %v3252_v20 }
 0x498   :  { %v3285_v33 = vmul.f32 %v3991_v32, %v4606_v47 }
 0x499   :  { %v3993_v35 = vpop.eup %3992 }
 0x49a   :  { %3301 = vst.msk [vmem:[%s4716_s4 + $0x50] sm:$0xff] %vm1991_vm2, %v3285_v33  ;;  %v3286_v36 = vmul.f32 %v3993_v35, %v4610_v50 }
 0x49c   :  { %3302 = vst.msk [vmem:[%s4716_s4 + $0x58] sm:$0xff] %vm1991_vm2, %v3286_v36  ;;  %v3255_v38 = vpop.xlane.xlu1 %3254 }
 0x49d   :  { %3998 = vrcp.f32 %v3255_v38 }
 0x49e   :  { %v3258_v39 = vpop.xlane.xlu0 %3257 }
 0x49f   :  { %v3995_v23 = vpop.eup %3994  ;;  %4000 = vrcp.f32 %v3258_v39 }
 0x4a0   :  { %v3287_v43 = vmul.f32 %v3995_v23, %v4616_v57 }
 0x4a1   :  { %v3997_v44 = vpop.eup %3996 }
 0x4a2   :  { %3303 = vst.msk [vmem:[%s4716_s4 + $0x60] sm:$0xff] %vm1991_vm2, %v3287_v43  ;;  %v3288_v26 = vmul.f32 %v3997_v44, %v4620_v60 }
 0x4a4   :  { %3304 = vst.msk [vmem:[%s4716_s4 + $0x68] sm:$0xff] %vm1991_vm2, %v3288_v26 }
 0x4a7   :  { %v3999_v45 = vpop.eup %3998 }
 0x4a8   :  { %v3289_v46 = vmul.f32 %v3999_v45, %v4624_v13 }
 0x4a9   :  { %v4001_v47 = vpop.eup %4000 }
 0x4aa   :  { %3305 = vst.msk [vmem:[%s4716_s4 + $0x70] sm:$0xff] %vm1991_vm2, %v3289_v46  ;;  %v3290_v49 = vmul.f32 %v4001_v47, %v4628_v14 }
 0x4ac   :  { %3306 = vst.msk [vmem:[%s4716_s4 + $0x78] sm:$0xff] %vm1991_vm2, %v3290_v49 }

</bundles_post_ra>
